<compile_context>
chip_gen: v7x
topology: tpu7x:2x2x1
jax: 0.10.0
libtpu: 0.0.40
codegen_flags: <defaults>
</compile_context>

<pallas_src>
import functools

import jax
import jax.numpy as jnp
from jax.experimental import pallas as pl
from jax.experimental.pallas import tpu as pltpu


def _round_up(x: int, m: int) -> int:
    return (x + m - 1) // m * m


# -----------------------------------------------------------------------------
# Kernel 1: fused 2-layer MLP, logits only
# -----------------------------------------------------------------------------
def _mlp_kernel(x_ref, w1_ref, w2_ref, o_ref):
    # x_ref:  [tb, d_in]  (bf16, pipelined)
    # w1_ref: [d_in, H]   (bf16, single resident VMEM copy)
    # w2_ref: [H, c_pad]  (bf16, single resident VMEM copy)
    # o_ref:  [tb, c_pad] (f32, lane-dense)
    h = jnp.dot(x_ref[...], w1_ref[...], preferred_element_type=jnp.float32)
    logits = jnp.dot(h.astype(w2_ref.dtype), w2_ref[...],
                     preferred_element_type=jnp.float32)
    o_ref[...] = logits.astype(o_ref.dtype)


# -----------------------------------------------------------------------------
# Kernel 2: fused 2-layer MLP + cross-entropy (mean over the true batch)
# -----------------------------------------------------------------------------
def _mlp_ce_kernel(x_ref, w1_ref, w2_ref, tgt_ref, o_ref, loss_ref,
                   *, batch: int, n_classes: int):
    i = pl.program_id(0)

    @pl.when(i == 0)
    def _():
        loss_ref[...] = jnp.zeros_like(loss_ref)

    h = jnp.dot(x_ref[...], w1_ref[...], preferred_element_type=jnp.float32)
    logits = jnp.dot(h.astype(w2_ref.dtype), w2_ref[...],
                     preferred_element_type=jnp.float32)
    o_ref[...] = logits.astype(o_ref.dtype)

    tb, c_pad = logits.shape
    col = jax.lax.broadcasted_iota(jnp.int32, (tb, c_pad), 1)

    # mask padded class columns out of the softmax (their logits are exactly 0).
    masked = jnp.where(col < n_classes, logits, jnp.float32(-1e30))
    m = jnp.max(masked, axis=-1, keepdims=True)
    shifted = masked - m
    lse = jnp.log(jnp.sum(jnp.exp(shifted), axis=-1, keepdims=True))
    logp = shifted - lse                                            # [tb, c_pad]

    # gather logp at the target class without materializing a one-hot.
    picked = jnp.sum(jnp.where(col == tgt_ref[...], logp, 0.0),
                     axis=-1, keepdims=True)                        # [tb, 1]

    # mask rows that only exist because of batch padding.
    row = i * tb + jax.lax.broadcasted_iota(jnp.int32, (tb, 1), 0)
    nll = jnp.where(row < batch, -picked, 0.0)

    loss_ref[...] += jnp.sum(nll, keepdims=True)

    @pl.when(i == pl.num_programs(0) - 1)
    def _():
        loss_ref[...] = loss_ref[...] / jnp.float32(batch)


# -----------------------------------------------------------------------------
# Wrappers
# -----------------------------------------------------------------------------
def _prep_inputs(x, w1_t, w2_t, tb, compute_dtype):
    B, d_in = x.shape
    h = w1_t.shape[1]
    d_out = w2_t.shape[1]
    assert w1_t.shape == (d_in, h) and w2_t.shape == (h, d_out)

    if tb is None:
        # big tile for MXU occupancy; for small batches use a single tile.
        tb = min(256, _round_up(B, 16))
    tb = max(16, _round_up(tb, 16))
    B_pad = _round_up(B, tb)
    c_pad = _round_up(d_out, 128)          # lane-dense output stores

    xc = x.astype(compute_dtype)
    if B_pad != B:
        xc = jnp.pad(xc, ((0, B_pad - B), (0, 0)))
    w1c = w1_t.astype(compute_dtype)
    w2c = w2_t.astype(compute_dtype)
    if c_pad != d_out:
        w2c = jnp.pad(w2c, ((0, 0), (0, c_pad - d_out)))
    return xc, w1c, w2c, tb, B_pad, c_pad, B, d_in, h, d_out


def _vmem_limit_bytes(tb, d_in, h, c_pad, compute_dtype):
    isize = jnp.dtype(compute_dtype).itemsize
    est = (d_in * h * isize + h * c_pad * isize   # resident weights (single copy each)
           + 2 * tb * d_in * isize                # double-buffered x tiles
           + 2 * tb * c_pad * 4                   # double-buffered f32 logits tiles
           + tb * h * 4                           # f32 intermediate
           + (4 << 20))                           # headroom
    return int(min(max(est, 32 << 20), 64 << 20))


def mlp_logits(x, w1_t, w2_t, *, tb=None, compute_dtype=jnp.bfloat16):
    xc, w1c, w2c, tb, B_pad, c_pad, B, d_in, h, d_out = _prep_inputs(
        x, w1_t, w2_t, tb, compute_dtype)
    isize = jnp.dtype(compute_dtype).itemsize
    cost = pl.CostEstimate(
        flops=2 * B_pad * (d_in * h + h * c_pad),
        transcendentals=0,
        bytes_accessed=(B_pad * d_in + d_in * h + h * c_pad) * isize
                       + B_pad * c_pad * 4)

    out = pl.pallas_call(
        _mlp_kernel,
        out_shape=jax.ShapeDtypeStruct((B_pad, c_pad), jnp.float32),
        grid_spec=pltpu.PrefetchScalarGridSpec(
            num_scalar_prefetch=0,
            grid=(B_pad // tb,),
            in_specs=[
                pl.BlockSpec((tb, d_in), lambda i: (i, 0)),
                pl.BlockSpec(memory_space=pltpu.MemorySpace.VMEM),  # W1t: 1 copy
                pl.BlockSpec(memory_space=pltpu.MemorySpace.VMEM),  # W2t: 1 copy
            ],
            out_specs=pl.BlockSpec((tb, c_pad), lambda i: (i, 0)),
        ),
        compiler_params=pltpu.CompilerParams(
            dimension_semantics=("parallel",),
            vmem_limit_bytes=_vmem_limit_bytes(tb, d_in, h, c_pad, compute_dtype)),
        cost_estimate=cost,
    )(xc, w1c, w2c)
    return out[:B, :d_out]


def mlp_logits_and_loss(x, w1_t, w2_t, targets, *, tb=None,
                        compute_dtype=jnp.bfloat16):
    xc, w1c, w2c, tb, B_pad, c_pad, B, d_in, h, d_out = _prep_inputs(
        x, w1_t, w2_t, tb, compute_dtype)
    tgt = targets.astype(jnp.int32).reshape(B, 1)
    if B_pad != B:
        tgt = jnp.pad(tgt, ((0, B_pad - B), (0, 0)))

    isize = jnp.dtype(compute_dtype).itemsize
    cost = pl.CostEstimate(
        flops=2 * B_pad * (d_in * h + h * c_pad),
        transcendentals=B_pad * c_pad,
        bytes_accessed=(B_pad * d_in + d_in * h + h * c_pad) * isize
                       + B_pad * 4 + B_pad * c_pad * 4 + 4)

    kernel = functools.partial(_mlp_ce_kernel, batch=B, n_classes=d_out)
    logits_pad, loss = pl.pallas_call(
        kernel,
        out_shape=(jax.ShapeDtypeStruct((B_pad, c_pad), jnp.float32),
                   jax.ShapeDtypeStruct((1, 1), jnp.float32)),
        grid_spec=pltpu.PrefetchScalarGridSpec(
            num_scalar_prefetch=0,
            grid=(B_pad // tb,),
            in_specs=[
                pl.BlockSpec((tb, d_in), lambda i: (i, 0)),
                pl.BlockSpec(memory_space=pltpu.MemorySpace.VMEM),
                pl.BlockSpec(memory_space=pltpu.MemorySpace.VMEM),
                pl.BlockSpec((tb, 1), lambda i: (i, 0)),
            ],
            out_specs=(
                pl.BlockSpec((tb, c_pad), lambda i: (i, 0)),
                pl.BlockSpec((1, 1), lambda i: (0, 0)),   # resident accumulator
            ),
        ),
        compiler_params=pltpu.CompilerParams(
            # batch axis carries the loss accumulator -> must be arbitrary.
            dimension_semantics=("arbitrary",),
            vmem_limit_bytes=_vmem_limit_bytes(tb, d_in, h, c_pad, compute_dtype)),
        cost_estimate=cost,
    )(xc, w1c, w2c, tgt)
    return logits_pad[:B, :d_out], loss[0, 0]


# -----------------------------------------------------------------------------
# Module-equivalent wrapper
# -----------------------------------------------------------------------------
def init_mlp_params(key, d_in, d_out, dtype=jnp.float32):
    """nn.Linear(input, input//2) and nn.Linear(input//2, output), both bias=False.
    Stored pre-transposed: w1_t [d_in, d_in//2], w2_t [d_in//2, d_out]."""
    h = d_in // 2
    k1, k2 = jax.random.split(key)
    b1 = 1.0 / jnp.sqrt(jnp.float32(d_in))
    b2 = 1.0 / jnp.sqrt(jnp.float32(h))
    w1_t = jax.random.uniform(k1, (d_in, h), dtype, -b1, b1)
    w2_t = jax.random.uniform(k2, (h, d_out), dtype, -b2, b2)
    return {"w1_t": w1_t, "w2_t": w2_t}


def mlp_forward(params, x, targets=None, *, tb=None, compute_dtype=jnp.bfloat16):
    """Mirrors MLP.forward: returns (logits, loss); loss is None when targets is None
    or a python int."""
    if targets is None or isinstance(targets, int):
        logits = mlp_logits(x, params["w1_t"], params["w2_t"],
                            tb=tb, compute_dtype=compute_dtype)
        return logits, None
    return mlp_logits_and_loss(x, params["w1_t"], params["w2_t"], targets,
                               tb=tb, compute_dtype=compute_dtype)


if __name__ == "__main__":
    key = jax.random.PRNGKey(0)
    kx, kt, kp = jax.random.split(key, 3)

    B, D_IN, D_OUT = 40, 32, 10
    x = jax.random.normal(kx, (B, D_IN), jnp.float32)
    targets = jax.random.randint(kt, (B,), 0, D_OUT, jnp.int32)
    params = init_mlp_params(kp, D_IN, D_OUT)

    # targets=None path (loss is None); default (single) batch tile + batch padding.
    logits_only, loss_none = mlp_forward(params, x, targets=None)
    jax.block_until_ready(logits_only)
    assert loss_none is None
    assert logits_only.shape == (B, D_OUT)

    # fused logits+loss path; small tile to exercise multi-step accumulation and
    # padded-row masking (B=40 padded to 48 with tb=16 -> 3 grid steps).
    logits, loss = mlp_forward(params, x, targets=targets, tb=16)
    jax.block_until_ready((logits, loss))

    # reference in plain JAX using the same bf16 compute path
    xc = x.astype(jnp.bfloat16)
    w1c = params["w1_t"].astype(jnp.bfloat16)
    w2c = params["w2_t"].astype(jnp.bfloat16)
    h_ref = jnp.dot(xc, w1c, preferred_element_type=jnp.float32)
    ref_logits = jnp.dot(h_ref.astype(jnp.bfloat16), w2c,
                         preferred_element_type=jnp.float32)
    ref_logp = jax.nn.log_softmax(ref_logits, axis=-1)
    ref_loss = -jnp.mean(ref_logp[jnp.arange(B), targets])

    assert jnp.allclose(logits_only, ref_logits, atol=2e-2, rtol=2e-2)
    assert jnp.allclose(logits, ref_logits, atol=2e-2, rtol=2e-2)
    assert jnp.allclose(loss, ref_loss, atol=2e-3, rtol=2e-3)

    print("KERNEL_OK")
</pallas_src>

<mosaic_0001>
module attributes {stable_mosaic.version = 11 : i64} {
  func.func @_mlp_kernel(%arg0: i32, %arg1: memref<48x32xbf16, #tpu.memory_space<vmem>>, %arg2: memref<32x16xbf16, #tpu.memory_space<vmem>>, %arg3: memref<16x128xbf16, #tpu.memory_space<vmem>>, %arg4: memref<48x128xf32, #tpu.memory_space<vmem>>) attributes {dimension_semantics = [#tpu.dimension_semantics<parallel>], iteration_bounds = array<i64: 1>, scalar_prefetch = 0 : i64, scratch_operands = 0 : i64, tpu.core_type = #tpu.core_type<tc>, window_params = [{transform_indices = @transform_0, window_bounds = array<i64: 48, 32>}, {pipeline_mode = #tpu.pipeline_mode<synchronous>, transform_indices = @transform_1, window_bounds = array<i64: 32, 16>}, {pipeline_mode = #tpu.pipeline_mode<synchronous>, transform_indices = @transform_2, window_bounds = array<i64: 16, 128>}, {transform_indices = @transform_3, window_bounds = array<i64: 48, 128>}]} {
    %c0 = arith.constant 0 : index
    %c0_0 = arith.constant 0 : index
    %0 = vector.load %arg1[%c0, %c0_0] : memref<48x32xbf16, #tpu.memory_space<vmem>>, vector<48x32xbf16>
    %c0_1 = arith.constant 0 : index
    %c0_2 = arith.constant 0 : index
    %1 = vector.load %arg2[%c0_1, %c0_2] : memref<32x16xbf16, #tpu.memory_space<vmem>>, vector<32x16xbf16>
    %cst = arith.constant dense<0.000000e+00> : vector<48x16xf32>
    %2 = tpu.matmul %0, %1, %cst {dimension_numbers = #tpu.dot_dimension_numbers<[1], [0], [0], [1], [0, 0, 1, 1], [], []>} : vector<48x32xbf16>, vector<32x16xbf16>, vector<48x16xf32> -> vector<48x16xf32>
    %3 = arith.truncf %2 : vector<48x16xf32> to vector<48x16xbf16>
    %c0_3 = arith.constant 0 : index
    %c0_4 = arith.constant 0 : index
    %4 = vector.load %arg3[%c0_3, %c0_4] : memref<16x128xbf16, #tpu.memory_space<vmem>>, vector<16x128xbf16>
    %cst_5 = arith.constant dense<0.000000e+00> : vector<48x128xf32>
    %5 = tpu.matmul %3, %4, %cst_5 {dimension_numbers = #tpu.dot_dimension_numbers<[1], [0], [0], [1], [0, 0, 1, 1], [], []>} : vector<48x16xbf16>, vector<16x128xbf16>, vector<48x128xf32> -> vector<48x128xf32>
    %c0_6 = arith.constant 0 : index
    %c0_7 = arith.constant 0 : index
    %6 = vector.load %arg4[%c0_6, %c0_7] : memref<48x128xf32, #tpu.memory_space<vmem>>, vector<48x128xf32>
    tpu.vector_store %arg4[%c0_6, %c0_7], %5 {strides = array<i32>} : memref<48x128xf32, #tpu.memory_space<vmem>>, vector<48x128xf32>,
    return
  }
  func.func @transform_0(%arg0: i32) -> (i32, i32) {
    %c0_i32 = arith.constant 0 : i32
    %c0_i32_0 = arith.constant 0 : i32
    return %arg0, %c0_i32 : i32, i32
  }
  func.func @transform_1(%arg0: i32) -> (i32, i32) {
    %c0_i32 = arith.constant 0 : i32
    %c0_i32_0 = arith.constant 0 : i32
    %c0_i32_1 = arith.constant 0 : i32
    return %c0_i32, %c0_i32_0 : i32, i32
  }
  func.func @transform_2(%arg0: i32) -> (i32, i32) {
    %c0_i32 = arith.constant 0 : i32
    %c0_i32_0 = arith.constant 0 : i32
    %c0_i32_1 = arith.constant 0 : i32
    return %c0_i32, %c0_i32_0 : i32, i32
  }
  func.func @transform_3(%arg0: i32) -> (i32, i32) {
    %c0_i32 = arith.constant 0 : i32
    %c0_i32_0 = arith.constant 0 : i32
    return %arg0, %c0_i32 : i32, i32
  }
}

</mosaic_0001>

<bundles_post_ra>
// kernel: tpu_custom_call.1
= control target key start
LH: loop header
LB: loop body
LE: loop exit
PB: predicated region body
PF: predicated region fallthrough
CT: control target
= control target key end

     0   :  { %v306_v1 = vmov 0.0   ;;  %vm307_vm0 = vmmov 0   ;;  %s370_s0 = inlined_call_operand.vmem [shape: bf16[48,32], index: 0, kind: input, shape index: {}]   ;;  %s371_s1 = inlined_call_operand.vmem [shape: bf16[32,16], index: 1, kind: input, shape index: {}]   ;;  %s372_s2 = inlined_call_operand.vmem [shape: bf16[16,128], index: 2, kind: input, shape index: {}]   ;;  %s373_s3 = inlined_call_operand.hbm [shape: f32[48,128], index: 3, kind: output, shape index: {}]  }
   0x1   :  { %v276_v0 = vld [vmem:[%s371_s1] sm:$0xff]   ;;  %241 = vmatprep.subr.bf16.mxu0 %v306_v1  ;;  %257 = vmatprep.subr.bf16.mxu1 %v306_v1  ;;  %v277_v2 = vld [vmem:[%s371_s1 + $0x8] sm:$0xff]  }
   0x2   :  { %242 = vmatpush3.bf16.msra.mxu0 %v276_v0  ;;  %245 = vmatprep.mubr.msk.bf16.mxu0 %vm307_vm0, %v306_v1  ;;  %v278_v3 = vld [vmem:[%s370_s0] sm:$0xff]  }
   0x3   :  { %243 = vmatprep.subr.bf16.mxu0 %v306_v1  ;;  %259 = vmatprep.mubr.msk.bf16.mxu1 %vm307_vm0, %v306_v1 }
   0x4   :  { %8 = vsyncpa [#allocation3], 0  ;;  %vm53_vm1 = vcmask 261120   ;;  %v279_v4 = vld [vmem:[%s370_s0 + $0x8] sm:$0xff]   ;;  %v280_v5 = vld [vmem:[%s370_s0 + $0x10] sm:$0xff]   ;;  %vm131_vm2 = vcmask 130048  }
   0x5   :  { %v281_v6 = vld [vmem:[%s372_s2] sm:$0xff]   ;;  %s308_s0 = smov [#allocation2]  }
   0x6   :  { %244 = vmatpush3.bf16.msra.mxu0 %v277_v2  ;;  %258 = vmatpush3.bf16.msra.mxu1 %v281_v6  ;;  %s209_s2 = sshll.u32 %s308_s0, 4  ;;  %s210_s2 = int_to_ptr.vmem [resolvable:$true] %s209_s2 }
   0x7   :  { %s282_s23 = scalar_lea.vmem %s210_s2, 768  ;;  %p287_p1 = scmp.lt.s32.totalorder %s210_s2, %s210_s2 }
   0x8   :  { %p283_p0 = scmp.ne.s32.totalorder %s210_s2, %s282_s23  ;;  %p288_p2 = scmp.lt.s32.totalorder %s282_s23, %s282_s23 }
   0x9   :  { %246 = vmatmul.mubr.msk.bf16.vlgmr.msra.gmra.mrb[0].mxu0 %vm53_vm1, %v278_v3 }
   0xa   :  { %249 = vmatprep.mubr.msk.bf16.mxu0 %vm307_vm0, %v306_v1  ;;  %p289_p3 = por %p288_p2, %p287_p1 }
   0xc   :  { %p290_p4 = pnand %p289_p3, %p283_p0 }
  0x11   :  { %250 = vmatmul.mubr.msk.bf16.gmra.mrb[4].mxu0 %vm53_vm1, %v279_v4 }
  0x12   :  { %253 = vmatprep.mubr.msk.bf16.mxu0 %vm307_vm0, %v306_v1 }
  0x19   :  { %254 = vmatmul.mubr.msk.bf16.gmra.mrb[8].mxu0 %vm53_vm1, %v280_v5 }
  0xdc   :  { %v97_v7 = vpop.f32.mrb[0].mxu0 }
  0xdd   :  { %v247_v8 = vpop.f32.mrb[1].mxu0 }
  0xde   :  { %v100_v9 = vpop.f32.mrb[2].mxu0 }
  0xdf   :  { %v120_v10 = vpack.c.bf16 %v100_v9, %v97_v7  ;;  %v248_v11 = vpop.f32.mrb[3].mxu0 }
  0xe1   :  { %260 = vmatmul.mubr.msk.bf16.vlgmr.msra.gmra.mrb[0].mxu1 %vm131_vm2, %v120_v10 }
  0xe2   :  { %263 = vmatprep.mubr.msk.bf16.mxu1 %vm307_vm0, %v306_v1 }
  0xe4   :  { %v105_v12 = vpop.f32.mrb[4].mxu0 }
  0xe5   :  { %v251_v13 = vpop.f32.mrb[5].mxu0 }
  0xe6   :  { %v108_v14 = vpop.f32.mrb[6].mxu0 }
  0xe7   :  { %v121_v15 = vpack.c.bf16 %v108_v14, %v105_v12  ;;  %v252_v16 = vpop.f32.mrb[7].mxu0 }
  0xe9   :  { %264 = vmatmul.mubr.msk.bf16.gmra.mrb[4].mxu1 %vm131_vm2, %v121_v15 }
  0xea   :  { %267 = vmatprep.mubr.msk.bf16.mxu1 %vm307_vm0, %v306_v1 }
  0xec   :  { %v113_v17 = vpop.f32.mrb[8].mxu0 }
  0xed   :  { %v255_v18 = vpop.f32.mrb[9].mxu0 }
  0xee   :  { %v116_v19 = vpop.f32.mrb[10].mxu0 }
  0xef   :  { %v122_v20 = vpack.c.bf16 %v116_v19, %v113_v17  ;;  %v256_v21 = vpop.f32.mrb[11].mxu0 }
  0xf1   :  { %268 = vmatmul.mubr.msk.bf16.gmra.mrb[8].mxu1 %vm131_vm2, %v122_v20 }
 0x1b4   :  { %v175_v22 = vpop.f32.mrb[0].mxu1 }
 0x1b5   :  { %198 = vst [vmem:[#allocation2] sm:$0xff] %v175_v22  ;;  %v261_v23 = vpop.f32.mrb[1].mxu1 }
 0x1b6   :  { %v178_v24 = vpop.f32.mrb[2].mxu1 }
 0x1b7   :  { %199 = vst [vmem:[#allocation2 + $0x8] sm:$0xff] %v178_v24  ;;  %v262_v25 = vpop.f32.mrb[3].mxu1 }
 0x1bc   :  { %v183_v26 = vpop.f32.mrb[4].mxu1 }
 0x1bd   :  { %200 = vst [vmem:[#allocation2 + $0x10] sm:$0xff] %v183_v26  ;;  %v265_v27 = vpop.f32.mrb[5].mxu1 }
 0x1be   :  { %v186_v28 = vpop.f32.mrb[6].mxu1 }
 0x1bf   :  { %201 = vst [vmem:[#allocation2 + $0x18] sm:$0xff] %v186_v28  ;;  %v266_v29 = vpop.f32.mrb[7].mxu1 }
 0x1c4   :  { %v191_v30 = vpop.f32.mrb[8].mxu1 }
 0x1c5   :  { %202 = vst [vmem:[#allocation2 + $0x20] sm:$0xff] %v191_v30  ;;  %v269_v31 = vpop.f32.mrb[9].mxu1 }
 0x1c6   :  { %v194_v32 = vpop.f32.mrb[10].mxu1 }
 0x1c7   :  { %203 = vst [vmem:[#allocation2 + $0x28] sm:$0xff] %v194_v32  ;;  %v270_v33 = vpop.f32.mrb[11].mxu1 }
 0x1c8   :  { %293 = shalt.err (!%p290_p4)
}
 0x1c9   :  { %s294_s26 = scalar_lea.hbm %s373_s3, 768 }
 0x1ca   :  { %p295_p5 = scmp.ne.s32.totalorder %s373_s3, %s294_s26  ;;  %p298_p6 = scmp.lt.u32.totalorder %s294_s26, %s373_s3 }
 0x1cc   :  { %p300_p7 = pnand %p298_p6, %p295_p5 }
 0x1ce   :  { %303 = shalt.err (!%p300_p7)
}
 0x1cf   :  { %s309_s4 = smov 128   ;;  %s310_s5 = smov 8  }
 0x1d0   :  { %215 = dma.vmem_to_hbm [thread:$0]  %s210_s2, 768, %s373_s3, [#allocation3], %s309_s4, %s309_s4, %s310_s5  }
 0x1d1   :  { %304 = dma.done.wait [#allocation3], 768  }
 0x1d2   :  { %305 = vsyncadd [#allocation3], 4294966528 }
 0x1d3   :  { %219 = vsyncpa [#allocation3], 1 }

</bundles_post_ra>
